<compile_context>
chip_gen: v5e
topology: v5e:2x2
jax: 0.10.0
libtpu: 0.0.40
codegen_flags: <defaults>
</compile_context>

<pallas_src>
import jax
import jax.numpy as jnp
from jax.experimental import pallas as pl
from jax.experimental.pallas import tpu as pltpu

ALPHA = 0.95
ARITY = 4
USE_SLACK = True
_LANES = 128  # TPU lane width


def _round_up(x, m):
    return ((x + m - 1) // m) * m


def _device_tile_config():
    """Per-generation (max batch-tile lanes, vmem_limit_bytes).

    Footprint per step (double-buffered, sublane-padded):
      x tile  (A, tb) f32 -> 8 * tb * 4 bytes per buffer
      out     (1, tb) f32 -> 8 * tb * 4 bytes per buffer
    so total ~ 128 * tb bytes.
    """
    try:
        kind = jax.devices()[0].device_kind.lower()
    except Exception:  # pragma: no cover - e.g. interpret-mode harness
        kind = ""
    if "v7" in kind:      # 64 MiB physical VMEM, 2 TCs -> keep footprint modest
        return 128 * 1024, 48 << 20
    if "v6" in kind:      # 128 MiB VMEM, ~1.4 TB/s HBM -> fattest tiles
        return 256 * 1024, 64 << 20
    if "v5" in kind:      # 128 MiB VMEM but lowest HBM BW
        return 128 * 1024, 64 << 20
    return 64 * 1024, 32 << 20  # unknown / CPU interpret fallback (safe)


def _and_lukasiewicz_kernel(params_ref, x_ref, pred_ref):
    """Weighted Lukasiewicz AND; arity on sublanes, batch on lanes.

    params_ref : SMEM (A+1,) f32, params[0] = beta - sum(w), params[1+a] = w_a
    x_ref      : VMEM (A, TB)  truth-value tile (arity x batch)
    pred_ref   : VMEM (1, TB)  lane-dense prediction row
    """
    A = x_ref.shape[0]
    x = x_ref[...].astype(jnp.float32)                       # (A, TB)
    # beta - sum_a w_a*(1 - x_a)  ==  (beta - sum w) + sum_a w_a * x_a
    acc = params_ref[0] + params_ref[1] * x[0:1, :]          # (1, TB)
    for a in range(1, A):                                    # unrolled FMAs (A is tiny)
        acc = acc + params_ref[1 + a] * x[a:a + 1, :]
    pred_ref[...] = jnp.clip(acc, 0.0, 1.0).astype(pred_ref.dtype)


def and_lukasiewicz_forward(x, w, beta, slacks, *, tb=None, out_dtype=jnp.float32,
                            arity_major=False):
    """Pallas-backed forward of the AND node.

    x           : (B, A) truth values in [0,1]  (or (A, B) if arity_major=True);
                  f32 or bf16, upcast in-kernel.
    w           : (A,)   nonnegative argument weights
    beta        : ()     bias
    slacks      : (A,)   nonnegative slack parameters
    returns (final_pred: (B,) out_dtype, final_slack: (A,))
    """
    if arity_major:
        xt = x                                   # producer already gives (A, B): no copy
        A, B = x.shape
    else:
        B, A = x.shape
        xt = jnp.transpose(x)                    # one dense relayout pass (see header)

    tb_max, vmem_limit = _device_tile_config()
    if tb is not None:
        tb_max = tb

    # Batch tile on the lane axis. No padding of x: ragged tails are partial blocks.
    if B <= 2 * _LANES:
        tb_eff = B                               # single block == full array dims
    else:
        half = _round_up(-(-B // 2), _LANES)     # ceil(B/2) rounded to 128
        tb_eff = max(_LANES, min(tb_max, half))  # guarantees >= 2 grid steps (v7x TCs)
    grid = (pl.cdiv(B, tb_eff),)

    # Parameters ride in SMEM: [beta - sum(w), w_0, ..., w_{A-1}].
    w32 = w.astype(jnp.float32)
    params = jnp.concatenate(
        [jnp.reshape(beta.astype(jnp.float32) - jnp.sum(w32), (1,)), w32])

    x_bytes = B * A * jnp.dtype(x.dtype).itemsize
    o_bytes = B * jnp.dtype(out_dtype).itemsize
    cost = pl.CostEstimate(flops=(2 * A + 2) * B, transcendentals=0,
                           bytes_accessed=x_bytes + o_bytes + (A + 1) * 4)

    pred = pl.pallas_call(
        _and_lukasiewicz_kernel,
        out_shape=jax.ShapeDtypeStruct((1, B), out_dtype),
        grid_spec=pltpu.PrefetchScalarGridSpec(
            num_scalar_prefetch=0,
            grid=grid,
            in_specs=[
                pl.BlockSpec(memory_space=pltpu.MemorySpace.SMEM),   # params (SMEM)
                pl.BlockSpec((A, tb_eff), lambda i: (0, i)),         # x tile
            ],
            out_specs=pl.BlockSpec((1, tb_eff), lambda i: (0, i)),   # lane-dense row
        ),
        compiler_params=pltpu.CompilerParams(
            dimension_semantics=("parallel",),
            vmem_limit_bytes=vmem_limit),
        cost_estimate=cost,
    )(params, xt)

    final_pred = pred[0]
    final_slack = slacks                          # parameter-only, independent of x
    return final_pred, final_slack


def init_and_node_params(arity=ARITY, alpha=ALPHA, use_slack=USE_SLACK):
    """Deterministic init of the lambda-parameterized constrained AND node."""
    key = jax.random.PRNGKey(42)
    k_w, k_s, k_l = jax.random.split(key, 3)

    raw_w = 1.0 + 0.1 * jax.random.normal(k_w, (arity,), jnp.float32)
    w = jax.nn.softplus(raw_w)                                     # w_a >= 0

    if use_slack:
        raw_s = 0.1 * jax.random.normal(k_s, (arity,), jnp.float32)
        slacks = jax.nn.softplus(raw_s)                            # s_a >= 0
    else:
        slacks = jnp.zeros((arity,), jnp.float32)

    lam = jax.nn.sigmoid(jax.random.normal(k_l, (), jnp.float32))  # lambda in (0,1)

    # LNN alpha-constraints define a feasible band for beta; lambda picks a point.
    lower = alpha + (1.0 - alpha) * jnp.sum(w)
    upper = jnp.min(1.0 - alpha + alpha * w + slacks)
    beta = lower + lam * jnp.maximum(upper - lower, 0.0)
    return beta, w, slacks


class SimpleAndLNNPallas:
    """JAX/Pallas port of SimpleAndLNN.forward (constrained, use_lambda=True)."""

    def __init__(self, arity=ARITY, use_slack=USE_SLACK, alpha=ALPHA, tb=None,
                 out_dtype=jnp.float32):
        self.arity = arity
        self.alpha = alpha
        self.use_slack = use_slack
        self.tb = tb
        self.out_dtype = out_dtype
        self.beta, self.w, self.slacks = init_and_node_params(arity, alpha, use_slack)

    def __call__(self, x, arity_major=False):
        return and_lukasiewicz_forward(x, self.w, self.beta, self.slacks,
                                       tb=self.tb, out_dtype=self.out_dtype,
                                       arity_major=arity_major)


def _reference(beta, w, x_bA):
    return jnp.clip(beta - jnp.sum(w * (1.0 - x_bA.astype(jnp.float32)), axis=-1),
                    0.0, 1.0)


if __name__ == "__main__":
    model = SimpleAndLNNPallas()
    B, A = 64, ARITY

    # f32, small batch (single-block path)
    x = jax.random.uniform(jax.random.PRNGKey(0), (B, A), jnp.float32)
    final_pred, final_slack = model(x)
    final_pred = jax.block_until_ready(final_pred)
    final_slack = jax.block_until_ready(final_slack)
    ref = _reference(model.beta, model.w, x)
    assert final_pred.shape == (B,)
    assert final_slack.shape == (A,)
    assert jnp.allclose(final_pred, ref, atol=1e-5)

    # arity-major producer layout (no wrapper transpose)
    pred_am, _ = model(jnp.transpose(x), arity_major=True)
    pred_am = jax.block_until_ready(pred_am)
    assert jnp.allclose(pred_am, ref, atol=1e-5)

    # multi-block + partial edge block path (B not a multiple of the tile)
    B2 = 1000
    x2 = jax.random.uniform(jax.random.PRNGKey(1), (B2, A), jnp.float32)
    pred2, _ = model(x2)
    pred2 = jax.block_until_ready(pred2)
    ref2 = _reference(model.beta, model.w, x2)
    assert pred2.shape == (B2,)
    assert jnp.allclose(pred2, ref2, atol=1e-5)

    # bf16 input path: compare against the reference evaluated on the SAME
    # bf16-rounded inputs (the quantization error of x itself is not the kernel's).
    x_bf16 = x.astype(jnp.bfloat16)
    pred_bf16, _ = model(x_bf16)
    pred_bf16 = jax.block_until_ready(pred_bf16)
    ref_bf16 = _reference(model.beta, model.w, x_bf16)
    assert jnp.allclose(pred_bf16, ref_bf16, atol=1e-4)

    print("KERNEL_OK")
</pallas_src>

<mosaic_0001>
module attributes {stable_mosaic.version = 11 : i64} {
  func.func @_and_lukasiewicz_kernel(%arg0: i32, %arg1: memref<5xf32, #tpu.memory_space<smem>>, %arg2: memref<4x64xf32, #tpu.memory_space<vmem>>, %arg3: memref<1x64xf32, #tpu.memory_space<vmem>>) attributes {dimension_semantics = [#tpu.dimension_semantics<parallel>], iteration_bounds = array<i64: 1>, scalar_prefetch = 0 : i64, scratch_operands = 0 : i64, tpu.core_type = #tpu.core_type<tc>, window_params = [{transform_indices = @transform_0, window_bounds = array<i64: 5>}, {transform_indices = @transform_1, window_bounds = array<i64: 4, 64>}, {transform_indices = @transform_2, window_bounds = array<i64: 1, 64>}]} {
    %c0 = arith.constant 0 : index
    %c0_0 = arith.constant 0 : index
    %0 = vector.load %arg2[%c0, %c0_0] : memref<4x64xf32, #tpu.memory_space<vmem>>, vector<4x64xf32>
    %c0_1 = arith.constant 0 : index
    %1 = memref.load %arg1[%c0_1] : memref<5xf32, #tpu.memory_space<smem>>
    %c1 = arith.constant 1 : index
    %2 = memref.load %arg1[%c1] : memref<5xf32, #tpu.memory_space<smem>>
    %3 = vector.extract_strided_slice %0 {offsets = [0, 0], sizes = [1, 64], strides = [1, 1]} : vector<4x64xf32> to vector<1x64xf32>
    %4 = vector.broadcast %2 : f32 to vector<1x64xf32>
    %5 = arith.mulf %4, %3 : vector<1x64xf32>
    %6 = vector.broadcast %1 : f32 to vector<1x64xf32>
    %7 = arith.addf %6, %5 : vector<1x64xf32>
    %c2 = arith.constant 2 : index
    %8 = memref.load %arg1[%c2] : memref<5xf32, #tpu.memory_space<smem>>
    %9 = vector.extract_strided_slice %0 {offsets = [1, 0], sizes = [1, 64], strides = [1, 1]} : vector<4x64xf32> to vector<1x64xf32>
    %10 = vector.broadcast %8 : f32 to vector<1x64xf32>
    %11 = arith.mulf %10, %9 : vector<1x64xf32>
    %12 = arith.addf %7, %11 : vector<1x64xf32>
    %c3 = arith.constant 3 : index
    %13 = memref.load %arg1[%c3] : memref<5xf32, #tpu.memory_space<smem>>
    %14 = vector.extract_strided_slice %0 {offsets = [2, 0], sizes = [1, 64], strides = [1, 1]} : vector<4x64xf32> to vector<1x64xf32>
    %15 = vector.broadcast %13 : f32 to vector<1x64xf32>
    %16 = arith.mulf %15, %14 : vector<1x64xf32>
    %17 = arith.addf %12, %16 : vector<1x64xf32>
    %c4 = arith.constant 4 : index
    %18 = memref.load %arg1[%c4] : memref<5xf32, #tpu.memory_space<smem>>
    %19 = vector.extract_strided_slice %0 {offsets = [3, 0], sizes = [1, 64], strides = [1, 1]} : vector<4x64xf32> to vector<1x64xf32>
    %20 = vector.broadcast %18 : f32 to vector<1x64xf32>
    %21 = arith.mulf %20, %19 : vector<1x64xf32>
    %22 = arith.addf %17, %21 : vector<1x64xf32>
    %cst = arith.constant 0.000000e+00 : f32
    %cst_2 = arith.constant 1.000000e+00 : f32
    %23 = vector.broadcast %cst : f32 to vector<1x64xf32>
    %24 = arith.maximumf %23, %22 : vector<1x64xf32>
    %25 = vector.broadcast %cst_2 : f32 to vector<1x64xf32>
    %26 = arith.minimumf %25, %24 : vector<1x64xf32>
    %c0_3 = arith.constant 0 : index
    %c0_4 = arith.constant 0 : index
    %27 = vector.load %arg3[%c0_3, %c0_4] : memref<1x64xf32, #tpu.memory_space<vmem>>, vector<1x64xf32>
    tpu.vector_store %arg3[%c0_3, %c0_4], %26 {strides = array<i32>} : memref<1x64xf32, #tpu.memory_space<vmem>>, vector<1x64xf32>,
    return
  }
  func.func @transform_0(%arg0: i32) -> i32 {
    %c0_i32 = arith.constant 0 : i32
    %c0_i32_0 = arith.constant 0 : i32
    return %c0_i32 : i32
  }
  func.func @transform_1(%arg0: i32) -> (i32, i32) {
    %c0_i32 = arith.constant 0 : i32
    %c0_i32_0 = arith.constant 0 : i32
    return %c0_i32, %arg0 : i32, i32
  }
  func.func @transform_2(%arg0: i32) -> (i32, i32) {
    %c0_i32 = arith.constant 0 : i32
    %c0_i32_0 = arith.constant 0 : i32
    return %c0_i32, %arg0 : i32, i32
  }
}

</mosaic_0001>

<bundles_post_ra>
// kernel: tpu_custom_call.1
= control target key start
LH: loop header
LB: loop body
LE: loop exit
PB: predicated region body
PF: predicated region fallthrough
CT: control target
= control target key end

     0   :  { %7 = vsyncpa [#allocation5], 0  ;;  %s189_s0 = inlined_call_operand.hbm [shape: f32[5], index: 0, kind: input, shape index: {}]   ;;  %s190_s1 = inlined_call_operand.hbm [shape: f32[4,64], index: 1, kind: input, shape index: {}]   ;;  %s191_s2 = inlined_call_operand.hbm [shape: f32[1,64], index: 2, kind: output, shape index: {}]  }
   0x1   :  { %8 = vsyncpa [#allocation3], 0 }
   0x2   :  { %9 = vsyncpa [#allocation4], 0  ;;  %s15_s11 = sshll.u32 %s189_s0, 4  ;;  %s24_s14 = sshll.u32 %s190_s1, 4  ;;  %s16_s11 = int_to_ptr.hbm [resolvable:$true] %s15_s11  ;;  %s25_s14 = int_to_ptr.hbm [resolvable:$true] %s24_s14 }
   0x3   :  { %s162_s15 = smov [#allocation2]   ;;  %s163_s16 = smov [#allocation6]  }
   0x4   :  { %18 = dma.hbm_to_smem %s16_s11, 16, %s162_s15, [#allocation5]  }
   0x5   :  { %s26_s17 = sshll.u32 %s163_s16, 4  ;;  %s27_s17 = int_to_ptr.vmem [resolvable:$true] %s26_s17 }
   0x6   :  { %29 = dma.hbm_to_vmem [thread:$0]  %s25_s14, 64, %s27_s17, [#allocation3]  }
   0x7   :  { %156 = dma.done.wait [#allocation5], 16  }
   0x8   :  { %157 = vsyncadd [#allocation5], 4294967280 }
   0x9   :  { %158 = dma.done.wait [#allocation3], 64  }
   0xa   :  { %159 = vsyncadd [#allocation3], 4294967232 }
   0xb   :  { %38 = sfence }
   0xc   :  { %s40_s18 = sld [smem:[#allocation2]]  ;;  %v39_v0 = vld [vmem:[#allocation6] sm:$0xf]  ;;  %s164_s1 = smov [#allocation7]   ;;  %vm69_vm0 = vcmask 516096  }
   0xd   :  { %s89_s19 = sld [smem:[#allocation2 + $0x1]]  ;;  %s76_s22 = sshll.u32 %s164_s1, 4  ;;  %s77_s22 = int_to_ptr.vmem [resolvable:$true] %s76_s22 }
   0xe   :  { %s90_s0 = sld [smem:[#allocation2 + $0x2]]  ;;  %s78_s25 = sshll.u32 %s191_s2, 4  ;;  %s79_s25 = int_to_ptr.hbm [resolvable:$true] %s78_s25 }
   0xf   :  { %s91_s20 = sld [smem:[#allocation2 + $0x3]] }
  0x10   :  { %s92_s21 = sld [smem:[#allocation2 + $0x4]] }
  0x12   :  { %v44_v2 = vstv %s40_s18 }
  0x13   :  { %v42_v1 = vstv %s89_s19 }
  0x14   :  { %v43_v3 = vmul.f32 %v42_v1, %v39_v0  ;;  %v47_v4 = vstv %s90_s0 }
  0x15   :  { %v48_v5 = vmul.f32 %v47_v4, %v39_v0  ;;  %v54_v6 = vstv %s91_s20 }
  0x16   :  { %v45_v7 = vadd.f32 %v44_v2, %v43_v3  ;;  %v55_v8 = vmul.f32 %v54_v6, %v39_v0  ;;  %v61_v9 = vstv %s92_s21 }
  0x17   :  { %v50_v10 = vrot.slane %v48_v5, 1  ;;  %v62_v11 = vmul.f32 %v61_v9, %v39_v0 }
  0x18   :  { %v57_v12 = vrot.slane %v55_v8, 2 }
  0x19   :  { %v52_v13 = vadd.f32 %v50_v10, %v45_v7  ;;  %v64_v14 = vrot.slane %v62_v11, 3 }
  0x1b   :  { %v59_v15 = vadd.f32 %v57_v12, %v52_v13 }
  0x1d   :  { %v66_v16 = vadd.f32 %v64_v14, %v59_v15 }
  0x1f   :  { %v67_v17 = vmax.f32 %v66_v16, 0.0 }
  0x21   :  { %v68_v18 = vmin.f32 %v67_v17, 1.0 }
  0x23   :  { %70 = vst.msk [vmem:[#allocation7] sm:$0x1] %vm69_vm0, %v68_v18 }
  0x24   :  { %81 = dma.vmem_to_hbm [thread:$0]  %s77_s22, 16, %s79_s25, [#allocation4]  }
  0x25   :  { %160 = dma.done.wait [#allocation4], 16  }
  0x26   :  { %161 = vsyncadd [#allocation4], 4294967280 }
  0x27   :  { %86 = vsyncpa [#allocation3], 1 }
  0x28   :  { %87 = vsyncpa [#allocation4], 1 }
  0x29   :  { %88 = vsyncpa [#allocation5], 1 }

</bundles_post_ra>
